<compile_context>
chip_gen: v7x
topology: tpu7x:2x2x1
jax: 0.10.0
libtpu: 0.0.40
codegen_flags: <defaults>
</compile_context>

<pallas_src>
import jax
import jax.numpy as jnp
from jax.experimental import pallas as pl
from jax.experimental.pallas import tpu as pltpu


def transition_up(x, skip, weight, bias, stride=2, row_pairs_per_step=8):
    """x: (N, Cin, H, W) NCHW; skip: (N, Cskip, Hs, Ws) NCHW.
    weight: (Cin, Cout, 3, 1) (PyTorch ConvTranspose2d layout); bias: (Cout,).
    Returns (N, Cout + Cskip, Hs, Ws)."""
    N, Cin, H, W = x.shape
    Cout = weight.shape[1]
    KH = weight.shape[2]
    assert KH == 3 and weight.shape[3] == 1 and stride == 2
    H_out = (H - 1) * stride + KH          # 2H + 1
    W_out = (W - 1) * stride + 1           # 2W - 1
    Hs, Ws = skip.shape[2], skip.shape[3]
    assert Hs <= H_out and Ws <= W_out
    y0 = (H_out - Hs) // 2                 # static crop offsets
    x0 = (W_out - Ws) // 2
    P = (Hs + 1) // 2                      # cropped-output row pairs per sample
    joff = (y0 + 1) // 2
    y0_even = (y0 % 2) == 0
    out_dtype = jnp.result_type(x.dtype, skip.dtype)
    cdt = jnp.result_type(x.dtype, weight.dtype)   # keep bf16 as bf16 for the MXU

    # ---- blocking: R row-pairs per grid step ----
    R = P if P <= row_pairs_per_step else row_pairs_per_step
    G = -(-P // R)                          # grid steps along the row axis
    Hp = (G + 1) * R                        # padded/shifted x rows the kernel reads from

    # ---- prep: ONE fused XLA pass over x (transpose + row shift + zero pad) ----
    # TODO(synk): this extra HBM pass disappears if the producing layer emits (N, H, Cin, W) directly.
    x_r = jnp.transpose(x, (0, 2, 1, 3)).astype(cdt)                  # (N, H, Cin, W)
    start = joff - 1                                                   # x row that lands at xp[0]
    front = max(0, -start)
    body = x_r[:, max(0, start):max(0, start) + (Hp - front), :, :]
    back = Hp - front - body.shape[1]
    xp = jnp.pad(body, ((0, 0), (front, back), (0, 0), (0, 0)))        # (N, Hp, Cin, W)
    # xp[m] = x[m + joff - 1] (zero when out of range) -> no validity masks in the kernel.

    w_t = jnp.transpose(weight[:, :, :, 0], (2, 1, 0)).astype(cdt)     # (3, Cout, Cin), tap-major
    b_v = bias.reshape(Cout, 1).astype(jnp.float32)                    # (Cout, 1)

    def kernel(xw_ref, xh_ref, w_ref, b_ref, o_ref):
        # Step (n, g): window rows = xp[g*R .. g*R+R] = xw_ref[0..R-1] plus halo xh_ref.
        # Pair r in this block: j = g*R + r + joff;  x[j] = window[r+1], x[j-1] = window[r].
        w0 = w_ref[0]                                   # (Cout, Cin)
        w1 = w_ref[1]
        w2 = w_ref[2]
        b = b_ref[...]                                  # (Cout, 1) f32
        # TODO(synk): when Cin % 8 == 0 the three tap matmuls per pair can be fused into one
        # (2Cout, 2Cin) x (2Cin, W) MXU call via a free sublane reshape of window[r:r+2].
        for r in range(R):                              # static unroll, R <= 8
            b_row = xw_ref[r]                                           # x[j-1]   (Cin, W)
            a_row = xw_ref[r + 1] if r + 1 < R else xh_ref[...]         # x[j]     (Cin, W)
            even = (jnp.dot(w0, a_row, preferred_element_type=jnp.float32)
                    + jnp.dot(w2, b_row, preferred_element_type=jnp.float32)
                    + b)                                                # even full row (Cout, W)
            odd = jnp.dot(w1, a_row if y0_even else b_row,
                          preferred_element_type=jnp.float32) + b       # odd full row  (Cout, W)
            top, bot = (even, odd) if y0_even else (odd, even)          # cropped-row order (static)
            o_ref[:, 2 * r, :] = top.astype(o_ref.dtype)
            o_ref[:, 2 * r + 1, :] = bot.astype(o_ref.dtype)

    itemsize_c = jnp.dtype(cdt).itemsize
    itemsize_o = jnp.dtype(out_dtype).itemsize
    flops = 2 * N * G * R * 3 * Cout * Cin * W                          # no scatter matmul anymore
    bytes_accessed = int(N * G * (R + 1) * Cin * W * itemsize_c         # x read once + halo
                         + 3 * Cout * Cin * itemsize_c + Cout * 4
                         + N * G * 2 * R * Cout * W * itemsize_o)       # packed (width-W) writes
    vmem_need = (2 * ((R + 1) * Cin * W * itemsize_c + 2 * R * Cout * W * itemsize_o)
                 + 3 * Cout * Cin * itemsize_c + Cout * 4)
    vmem_limit = int(min(48 * 2 ** 20, max(32 * 2 ** 20, 2 * vmem_need)))  # keep headroom on v7x (64 MiB)

    packed = pl.pallas_call(
        kernel,
        out_shape=jax.ShapeDtypeStruct((N, Cout, 2 * G * R, W), out_dtype),
        grid=(N, G),
        in_specs=[
            pl.BlockSpec((None, R, Cin, W), lambda n, g: (n, g, 0, 0)),            # xp[g*R : g*R+R]
            pl.BlockSpec((None, None, Cin, W), lambda n, g: (n, g * R + R, 0, 0)),  # halo row xp[g*R+R]
            pl.BlockSpec((KH, Cout, Cin), lambda n, g: (0, 0, 0)),                  # VMEM-resident weights
            pl.BlockSpec((Cout, 1), lambda n, g: (0, 0)),                           # VMEM-resident bias
        ],
        out_specs=pl.BlockSpec((None, Cout, 2 * R, W), lambda n, g: (n, 0, g, 0)),
        compiler_params=pltpu.CompilerParams(
            dimension_semantics=("parallel", "parallel"),
            vmem_limit_bytes=vmem_limit),
        cost_estimate=pl.CostEstimate(flops=flops, transcendentals=0,
                                      bytes_accessed=bytes_accessed),
    )(xp, xp, w_t, b_v)

    # ---- cheap XLA epilogue (fuses with the concat copy): row crop, column interleave
    #      (odd output columns are bias-only), width crop, channel concat with skip. ----
    packed = packed[:, :, :Hs, :]                                       # (N, Cout, Hs, W) even cols
    bias_plane = jnp.broadcast_to(
        bias.astype(jnp.float32).astype(out_dtype)[None, :, None, None], packed.shape)
    inter = jnp.stack([packed, bias_plane], axis=-1).reshape(N, Cout, Hs, 2 * W)
    conv = inter[:, :, :, x0:x0 + Ws]                                   # width crop
    # TODO(synk): the channel concat with `skip` stays in XLA (one unavoidable copy).
    return jnp.concatenate([conv, skip.astype(out_dtype)], axis=1)


def _reference(x, skip, weight, bias, stride=2):
    """Pure-JAX reference of the same ConvTranspose2d -> crop -> concat semantics."""
    N, Cin, H, W = x.shape
    Cout, KH = weight.shape[1], weight.shape[2]
    H_out = (H - 1) * stride + KH
    W_out = (W - 1) * stride + 1
    xf = x.astype(jnp.float32)
    out = jnp.broadcast_to(bias.astype(jnp.float32)[None, :, None, None],
                           (N, Cout, H_out, W_out))
    for kh in range(KH):
        tap = jnp.einsum('nchw,cd->ndhw', xf, weight[:, :, kh, 0].astype(jnp.float32))
        out = out.at[:, :, kh:kh + (H - 1) * stride + 1:stride,
                     0:(W - 1) * stride + 1:stride].add(tap)
    Hs, Ws = skip.shape[2], skip.shape[3]
    y0 = (H_out - Hs) // 2
    x0 = (W_out - Ws) // 2
    out_dtype = jnp.result_type(x.dtype, skip.dtype)
    out = out[:, :, y0:y0 + Hs, x0:x0 + Ws].astype(out_dtype)
    return jnp.concatenate([out, skip.astype(out_dtype)], axis=1)


if __name__ == "__main__":
    key = jax.random.PRNGKey(0)
    kx, ks1, kw, kb, ks2, kx3, ks3, ks4 = jax.random.split(key, 8)

    N, Cin, Cout, Cskip = 2, 4, 4, 3
    stride = 2

    x = jax.random.normal(kx, (N, Cin, 8, 8), dtype=jnp.float32)          # H_out=17, W_out=15
    weight = jax.random.normal(kw, (Cin, Cout, 3, 1), dtype=jnp.float32) * 0.1
    bias = jax.random.normal(kb, (Cout,), dtype=jnp.float32) * 0.1

    # case 1: even crop offsets, single grid block (G=1)
    skip1 = jax.random.normal(ks1, (N, Cskip, 16, 14), dtype=jnp.float32)
    out1 = jax.block_until_ready(transition_up(x, skip1, weight, bias, stride=stride))
    ref1 = _reference(x, skip1, weight, bias, stride=stride)
    assert out1.shape == (N, Cout + Cskip, 16, 14), out1.shape
    assert jnp.allclose(out1, ref1, atol=1e-5, rtol=1e-5), float(jnp.max(jnp.abs(out1 - ref1)))

    # case 2: odd crop offsets + odd cropped height (other parity path + discarded pad row)
    skip2 = jax.random.normal(ks2, (N, Cskip, 15, 13), dtype=jnp.float32)
    out2 = jax.block_until_ready(transition_up(x, skip2, weight, bias, stride=stride))
    ref2 = _reference(x, skip2, weight, bias, stride=stride)
    assert out2.shape == (N, Cout + Cskip, 15, 13), out2.shape
    assert jnp.allclose(out2, ref2, atol=1e-5, rtol=1e-5), float(jnp.max(jnp.abs(out2 - ref2)))

    # case 3: taller input -> multi-block grid (G=3), halo rows across block boundaries, odd parity
    x3 = jax.random.normal(kx3, (N, Cin, 24, 8), dtype=jnp.float32)       # H_out=49, W_out=15
    skip3 = jax.random.normal(ks3, (N, Cskip, 47, 13), dtype=jnp.float32)
    out3 = jax.block_until_ready(transition_up(x3, skip3, weight, bias, stride=stride))
    ref3 = _reference(x3, skip3, weight, bias, stride=stride)
    assert out3.shape == (N, Cout + Cskip, 47, 13), out3.shape
    assert jnp.allclose(out3, ref3, atol=1e-5, rtol=1e-5), float(jnp.max(jnp.abs(out3 - ref3)))

    # case 4: even parity, P not divisible by R (tail pairs computed then discarded by row crop)
    skip4 = jax.random.normal(ks4, (N, Cskip, 45, 15), dtype=jnp.float32)
    out4 = jax.block_until_ready(transition_up(x3, skip4, weight, bias, stride=stride))
    ref4 = _reference(x3, skip4, weight, bias, stride=stride)
    assert out4.shape == (N, Cout + Cskip, 45, 15), out4.shape
    assert jnp.allclose(out4, ref4, atol=1e-5, rtol=1e-5), float(jnp.max(jnp.abs(out4 - ref4)))

    print("KERNEL_OK")
</pallas_src>

<mosaic_0001>
module attributes {stable_mosaic.version = 11 : i64} {
  func.func @kernel(%arg0: i32, %arg1: i32, %arg2: memref<1x8x4x8xf32, #tpu.memory_space<vmem>>, %arg3: memref<1x1x4x8xf32, #tpu.memory_space<vmem>>, %arg4: memref<3x4x4xf32, #tpu.memory_space<vmem>>, %arg5: memref<4x1xf32, #tpu.memory_space<vmem>>, %arg6: memref<1x4x16x8xf32, #tpu.memory_space<vmem>>) attributes {dimension_semantics = [#tpu.dimension_semantics<parallel>, #tpu.dimension_semantics<parallel>], iteration_bounds = array<i64: 2, 1>, scalar_prefetch = 0 : i64, scratch_operands = 0 : i64, tpu.core_type = #tpu.core_type<tc>, window_params = [{transform_indices = @transform_0, window_bounds = array<i64: 1, 8, 4, 8>}, {transform_indices = @transform_1, window_bounds = array<i64: 1, 1, 4, 8>}, {pipeline_mode = #tpu.pipeline_mode<synchronous>, transform_indices = @transform_2, window_bounds = array<i64: 3, 4, 4>}, {pipeline_mode = #tpu.pipeline_mode<synchronous>, transform_indices = @transform_3, window_bounds = array<i64: 4, 1>}, {transform_indices = @transform_4, window_bounds = array<i64: 1, 4, 16, 8>}]} {
    %c0 = arith.constant 0 : index
    %c0_0 = arith.constant 0 : index
    %c0_1 = arith.constant 0 : index
    %0 = vector.load %arg4[%c0, %c0_0, %c0_1] : memref<3x4x4xf32, #tpu.memory_space<vmem>>, vector<1x4x4xf32>
    %1 = vector.shape_cast %0 : vector<1x4x4xf32> to vector<4x4xf32>
    %c1 = arith.constant 1 : index
    %c0_2 = arith.constant 0 : index
    %c0_3 = arith.constant 0 : index
    %2 = vector.load %arg4[%c1, %c0_2, %c0_3] : memref<3x4x4xf32, #tpu.memory_space<vmem>>, vector<1x4x4xf32>
    %3 = vector.shape_cast %2 : vector<1x4x4xf32> to vector<4x4xf32>
    %c2 = arith.constant 2 : index
    %c0_4 = arith.constant 0 : index
    %c0_5 = arith.constant 0 : index
    %4 = vector.load %arg4[%c2, %c0_4, %c0_5] : memref<3x4x4xf32, #tpu.memory_space<vmem>>, vector<1x4x4xf32>
    %5 = vector.shape_cast %4 : vector<1x4x4xf32> to vector<4x4xf32>
    %c0_6 = arith.constant 0 : index
    %c0_7 = arith.constant 0 : index
    %6 = vector.load %arg5[%c0_6, %c0_7] : memref<4x1xf32, #tpu.memory_space<vmem>>, vector<4x1xf32>
    %c0_8 = arith.constant 0 : index
    %c0_9 = arith.constant 0 : index
    %c0_10 = arith.constant 0 : index
    %c0_11 = arith.constant 0 : index
    %7 = vector.load %arg2[%c0_8, %c0_9, %c0_10, %c0_11] : memref<1x8x4x8xf32, #tpu.memory_space<vmem>>, vector<1x1x4x8xf32>
    %8 = vector.shape_cast %7 : vector<1x1x4x8xf32> to vector<4x8xf32>
    %c0_12 = arith.constant 0 : index
    %c1_13 = arith.constant 1 : index
    %c0_14 = arith.constant 0 : index
    %c0_15 = arith.constant 0 : index
    %9 = vector.load %arg2[%c0_12, %c1_13, %c0_14, %c0_15] : memref<1x8x4x8xf32, #tpu.memory_space<vmem>>, vector<1x1x4x8xf32>
    %10 = vector.shape_cast %9 : vector<1x1x4x8xf32> to vector<4x8xf32>
    %cst = arith.constant dense<0.000000e+00> : vector<4x8xf32>
    %11 = tpu.matmul %1, %10, %cst {dimension_numbers = #tpu.dot_dimension_numbers<[1], [0], [0], [1], [0, 0, 1, 1], [], []>} : vector<4x4xf32>, vector<4x8xf32>, vector<4x8xf32> -> vector<4x8xf32>
    %cst_16 = arith.constant dense<0.000000e+00> : vector<4x8xf32>
    %12 = tpu.matmul %5, %8, %cst_16 {dimension_numbers = #tpu.dot_dimension_numbers<[1], [0], [0], [1], [0, 0, 1, 1], [], []>} : vector<4x4xf32>, vector<4x8xf32>, vector<4x8xf32> -> vector<4x8xf32>
    %13 = arith.addf %11, %12 : vector<4x8xf32>
    %14 = vector.broadcast %6 : vector<4x1xf32> to vector<4x8xf32>
    %15 = arith.addf %13, %14 : vector<4x8xf32>
    %cst_17 = arith.constant dense<0.000000e+00> : vector<4x8xf32>
    %16 = tpu.matmul %3, %10, %cst_17 {dimension_numbers = #tpu.dot_dimension_numbers<[1], [0], [0], [1], [0, 0, 1, 1], [], []>} : vector<4x4xf32>, vector<4x8xf32>, vector<4x8xf32> -> vector<4x8xf32>
    %17 = vector.broadcast %6 : vector<4x1xf32> to vector<4x8xf32>
    %18 = arith.addf %16, %17 : vector<4x8xf32>
    %c0_18 = arith.constant 0 : index
    %c0_19 = arith.constant 0 : index
    %c0_20 = arith.constant 0 : index
    %c0_21 = arith.constant 0 : index
    %19 = vector.load %arg6[%c0_18, %c0_19, %c0_20, %c0_21] : memref<1x4x16x8xf32, #tpu.memory_space<vmem>>, vector<1x4x1x8xf32>
    %20 = vector.shape_cast %19 : vector<1x4x1x8xf32> to vector<4x8xf32>
    %21 = vector.shape_cast %15 : vector<4x8xf32> to vector<1x4x1x8xf32>
    tpu.vector_store %arg6[%c0_18, %c0_19, %c0_20, %c0_21], %21 {strides = array<i32>} : memref<1x4x16x8xf32, #tpu.memory_space<vmem>>, vector<1x4x1x8xf32>,
    %c0_22 = arith.constant 0 : index
    %c0_23 = arith.constant 0 : index
    %c1_24 = arith.constant 1 : index
    %c0_25 = arith.constant 0 : index
    %22 = vector.load %arg6[%c0_22, %c0_23, %c1_24, %c0_25] : memref<1x4x16x8xf32, #tpu.memory_space<vmem>>, vector<1x4x1x8xf32>
    %23 = vector.shape_cast %22 : vector<1x4x1x8xf32> to vector<4x8xf32>
    %24 = vector.shape_cast %18 : vector<4x8xf32> to vector<1x4x1x8xf32>
    tpu.vector_store %arg6[%c0_22, %c0_23, %c1_24, %c0_25], %24 {strides = array<i32>} : memref<1x4x16x8xf32, #tpu.memory_space<vmem>>, vector<1x4x1x8xf32>,
    %c0_26 = arith.constant 0 : index
    %c1_27 = arith.constant 1 : index
    %c0_28 = arith.constant 0 : index
    %c0_29 = arith.constant 0 : index
    %25 = vector.load %arg2[%c0_26, %c1_27, %c0_28, %c0_29] : memref<1x8x4x8xf32, #tpu.memory_space<vmem>>, vector<1x1x4x8xf32>
    %26 = vector.shape_cast %25 : vector<1x1x4x8xf32> to vector<4x8xf32>
    %c0_30 = arith.constant 0 : index
    %c2_31 = arith.constant 2 : index
    %c0_32 = arith.constant 0 : index
    %c0_33 = arith.constant 0 : index
    %27 = vector.load %arg2[%c0_30, %c2_31, %c0_32, %c0_33] : memref<1x8x4x8xf32, #tpu.memory_space<vmem>>, vector<1x1x4x8xf32>
    %28 = vector.shape_cast %27 : vector<1x1x4x8xf32> to vector<4x8xf32>
    %cst_34 = arith.constant dense<0.000000e+00> : vector<4x8xf32>
    %29 = tpu.matmul %1, %28, %cst_34 {dimension_numbers = #tpu.dot_dimension_numbers<[1], [0], [0], [1], [0, 0, 1, 1], [], []>} : vector<4x4xf32>, vector<4x8xf32>, vector<4x8xf32> -> vector<4x8xf32>
    %cst_35 = arith.constant dense<0.000000e+00> : vector<4x8xf32>
    %30 = tpu.matmul %5, %26, %cst_35 {dimension_numbers = #tpu.dot_dimension_numbers<[1], [0], [0], [1], [0, 0, 1, 1], [], []>} : vector<4x4xf32>, vector<4x8xf32>, vector<4x8xf32> -> vector<4x8xf32>
    %31 = arith.addf %29, %30 : vector<4x8xf32>
    %32 = vector.broadcast %6 : vector<4x1xf32> to vector<4x8xf32>
    %33 = arith.addf %31, %32 : vector<4x8xf32>
    %cst_36 = arith.constant dense<0.000000e+00> : vector<4x8xf32>
    %34 = tpu.matmul %3, %28, %cst_36 {dimension_numbers = #tpu.dot_dimension_numbers<[1], [0], [0], [1], [0, 0, 1, 1], [], []>} : vector<4x4xf32>, vector<4x8xf32>, vector<4x8xf32> -> vector<4x8xf32>
    %35 = vector.broadcast %6 : vector<4x1xf32> to vector<4x8xf32>
    %36 = arith.addf %34, %35 : vector<4x8xf32>
    %c0_37 = arith.constant 0 : index
    %c0_38 = arith.constant 0 : index
    %c2_39 = arith.constant 2 : index
    %c0_40 = arith.constant 0 : index
    %37 = vector.load %arg6[%c0_37, %c0_38, %c2_39, %c0_40] : memref<1x4x16x8xf32, #tpu.memory_space<vmem>>, vector<1x4x1x8xf32>
    %38 = vector.shape_cast %37 : vector<1x4x1x8xf32> to vector<4x8xf32>
    %39 = vector.shape_cast %33 : vector<4x8xf32> to vector<1x4x1x8xf32>
    tpu.vector_store %arg6[%c0_37, %c0_38, %c2_39, %c0_40], %39 {strides = array<i32>} : memref<1x4x16x8xf32, #tpu.memory_space<vmem>>, vector<1x4x1x8xf32>,
    %c0_41 = arith.constant 0 : index
    %c0_42 = arith.constant 0 : index
    %c3 = arith.constant 3 : index
    %c0_43 = arith.constant 0 : index
    %40 = vector.load %arg6[%c0_41, %c0_42, %c3, %c0_43] : memref<1x4x16x8xf32, #tpu.memory_space<vmem>>, vector<1x4x1x8xf32>
    %41 = vector.shape_cast %40 : vector<1x4x1x8xf32> to vector<4x8xf32>
    %42 = vector.shape_cast %36 : vector<4x8xf32> to vector<1x4x1x8xf32>
    tpu.vector_store %arg6[%c0_41, %c0_42, %c3, %c0_43], %42 {strides = array<i32>} : memref<1x4x16x8xf32, #tpu.memory_space<vmem>>, vector<1x4x1x8xf32>,
    %c0_44 = arith.constant 0 : index
    %c2_45 = arith.constant 2 : index
    %c0_46 = arith.constant 0 : index
    %c0_47 = arith.constant 0 : index
    %43 = vector.load %arg2[%c0_44, %c2_45, %c0_46, %c0_47] : memref<1x8x4x8xf32, #tpu.memory_space<vmem>>, vector<1x1x4x8xf32>
    %44 = vector.shape_cast %43 : vector<1x1x4x8xf32> to vector<4x8xf32>
    %c0_48 = arith.constant 0 : index
    %c3_49 = arith.constant 3 : index
    %c0_50 = arith.constant 0 : index
    %c0_51 = arith.constant 0 : index
    %45 = vector.load %arg2[%c0_48, %c3_49, %c0_50, %c0_51] : memref<1x8x4x8xf32, #tpu.memory_space<vmem>>, vector<1x1x4x8xf32>
    %46 = vector.shape_cast %45 : vector<1x1x4x8xf32> to vector<4x8xf32>
    %cst_52 = arith.constant dense<0.000000e+00> : vector<4x8xf32>
    %47 = tpu.matmul %1, %46, %cst_52 {dimension_numbers = #tpu.dot_dimension_numbers<[1], [0], [0], [1], [0, 0, 1, 1], [], []>} : vector<4x4xf32>, vector<4x8xf32>, vector<4x8xf32> -> vector<4x8xf32>
    %cst_53 = arith.constant dense<0.000000e+00> : vector<4x8xf32>
    %48 = tpu.matmul %5, %44, %cst_53 {dimension_numbers = #tpu.dot_dimension_numbers<[1], [0], [0], [1], [0, 0, 1, 1], [], []>} : vector<4x4xf32>, vector<4x8xf32>, vector<4x8xf32> -> vector<4x8xf32>
    %49 = arith.addf %47, %48 : vector<4x8xf32>
    %50 = vector.broadcast %6 : vector<4x1xf32> to vector<4x8xf32>
    %51 = arith.addf %49, %50 : vector<4x8xf32>
    %cst_54 = arith.constant dense<0.000000e+00> : vector<4x8xf32>
    %52 = tpu.matmul %3, %46, %cst_54 {dimension_numbers = #tpu.dot_dimension_numbers<[1], [0], [0], [1], [0, 0, 1, 1], [], []>} : vector<4x4xf32>, vector<4x8xf32>, vector<4x8xf32> -> vector<4x8xf32>
    %53 = vector.broadcast %6 : vector<4x1xf32> to vector<4x8xf32>
    %54 = arith.addf %52, %53 : vector<4x8xf32>
    %c0_55 = arith.constant 0 : index
    %c0_56 = arith.constant 0 : index
    %c4 = arith.constant 4 : index
    %c0_57 = arith.constant 0 : index
    %55 = vector.load %arg6[%c0_55, %c0_56, %c4, %c0_57] : memref<1x4x16x8xf32, #tpu.memory_space<vmem>>, vector<1x4x1x8xf32>
    %56 = vector.shape_cast %55 : vector<1x4x1x8xf32> to vector<4x8xf32>
    %57 = vector.shape_cast %51 : vector<4x8xf32> to vector<1x4x1x8xf32>
    tpu.vector_store %arg6[%c0_55, %c0_56, %c4, %c0_57], %57 {strides = array<i32>} : memref<1x4x16x8xf32, #tpu.memory_space<vmem>>, vector<1x4x1x8xf32>,
    %c0_58 = arith.constant 0 : index
    %c0_59 = arith.constant 0 : index
    %c5 = arith.constant 5 : index
    %c0_60 = arith.constant 0 : index
    %58 = vector.load %arg6[%c0_58, %c0_59, %c5, %c0_60] : memref<1x4x16x8xf32, #tpu.memory_space<vmem>>, vector<1x4x1x8xf32>
    %59 = vector.shape_cast %58 : vector<1x4x1x8xf32> to vector<4x8xf32>
    %60 = vector.shape_cast %54 : vector<4x8xf32> to vector<1x4x1x8xf32>
    tpu.vector_store %arg6[%c0_58, %c0_59, %c5, %c0_60], %60 {strides = array<i32>} : memref<1x4x16x8xf32, #tpu.memory_space<vmem>>, vector<1x4x1x8xf32>,
    %c0_61 = arith.constant 0 : index
    %c3_62 = arith.constant 3 : index
    %c0_63 = arith.constant 0 : index
    %c0_64 = arith.constant 0 : index
    %61 = vector.load %arg2[%c0_61, %c3_62, %c0_63, %c0_64] : memref<1x8x4x8xf32, #tpu.memory_space<vmem>>, vector<1x1x4x8xf32>
    %62 = vector.shape_cast %61 : vector<1x1x4x8xf32> to vector<4x8xf32>
    %c0_65 = arith.constant 0 : index
    %c4_66 = arith.constant 4 : index
    %c0_67 = arith.constant 0 : index
    %c0_68 = arith.constant 0 : index
    %63 = vector.load %arg2[%c0_65, %c4_66, %c0_67, %c0_68] : memref<1x8x4x8xf32, #tpu.memory_space<vmem>>, vector<1x1x4x8xf32>
    %64 = vector.shape_cast %63 : vector<1x1x4x8xf32> to vector<4x8xf32>
    %cst_69 = arith.constant dense<0.000000e+00> : vector<4x8xf32>
    %65 = tpu.matmul %1, %64, %cst_69 {dimension_numbers = #tpu.dot_dimension_numbers<[1], [0], [0], [1], [0, 0, 1, 1], [], []>} : vector<4x4xf32>, vector<4x8xf32>, vector<4x8xf32> -> vector<4x8xf32>
    %cst_70 = arith.constant dense<0.000000e+00> : vector<4x8xf32>
    %66 = tpu.matmul %5, %62, %cst_70 {dimension_numbers = #tpu.dot_dimension_numbers<[1], [0], [0], [1], [0, 0, 1, 1], [], []>} : vector<4x4xf32>, vector<4x8xf32>, vector<4x8xf32> -> vector<4x8xf32>
    %67 = arith.addf %65, %66 : vector<4x8xf32>
    %68 = vector.broadcast %6 : vector<4x1xf32> to vector<4x8xf32>
    %69 = arith.addf %67, %68 : vector<4x8xf32>
    %cst_71 = arith.constant dense<0.000000e+00> : vector<4x8xf32>
    %70 = tpu.matmul %3, %64, %cst_71 {dimension_numbers = #tpu.dot_dimension_numbers<[1], [0], [0], [1], [0, 0, 1, 1], [], []>} : vector<4x4xf32>, vector<4x8xf32>, vector<4x8xf32> -> vector<4x8xf32>
    %71 = vector.broadcast %6 : vector<4x1xf32> to vector<4x8xf32>
    %72 = arith.addf %70, %71 : vector<4x8xf32>
    %c0_72 = arith.constant 0 : index
    %c0_73 = arith.constant 0 : index
    %c6 = arith.constant 6 : index
    %c0_74 = arith.constant 0 : index
    %73 = vector.load %arg6[%c0_72, %c0_73, %c6, %c0_74] : memref<1x4x16x8xf32, #tpu.memory_space<vmem>>, vector<1x4x1x8xf32>
    %74 = vector.shape_cast %73 : vector<1x4x1x8xf32> to vector<4x8xf32>
    %75 = vector.shape_cast %69 : vector<4x8xf32> to vector<1x4x1x8xf32>
    tpu.vector_store %arg6[%c0_72, %c0_73, %c6, %c0_74], %75 {strides = array<i32>} : memref<1x4x16x8xf32, #tpu.memory_space<vmem>>, vector<1x4x1x8xf32>,
    %c0_75 = arith.constant 0 : index
    %c0_76 = arith.constant 0 : index
    %c7 = arith.constant 7 : index
    %c0_77 = arith.constant 0 : index
    %76 = vector.load %arg6[%c0_75, %c0_76, %c7, %c0_77] : memref<1x4x16x8xf32, #tpu.memory_space<vmem>>, vector<1x4x1x8xf32>
    %77 = vector.shape_cast %76 : vector<1x4x1x8xf32> to vector<4x8xf32>
    %78 = vector.shape_cast %72 : vector<4x8xf32> to vector<1x4x1x8xf32>
    tpu.vector_store %arg6[%c0_75, %c0_76, %c7, %c0_77], %78 {strides = array<i32>} : memref<1x4x16x8xf32, #tpu.memory_space<vmem>>, vector<1x4x1x8xf32>,
    %c0_78 = arith.constant 0 : index
    %c4_79 = arith.constant 4 : index
    %c0_80 = arith.constant 0 : index
    %c0_81 = arith.constant 0 : index
    %79 = vector.load %arg2[%c0_78, %c4_79, %c0_80, %c0_81] : memref<1x8x4x8xf32, #tpu.memory_space<vmem>>, vector<1x1x4x8xf32>
    %80 = vector.shape_cast %79 : vector<1x1x4x8xf32> to vector<4x8xf32>
    %c0_82 = arith.constant 0 : index
    %c5_83 = arith.constant 5 : index
    %c0_84 = arith.constant 0 : index
    %c0_85 = arith.constant 0 : index
    %81 = vector.load %arg2[%c0_82, %c5_83, %c0_84, %c0_85] : memref<1x8x4x8xf32, #tpu.memory_space<vmem>>, vector<1x1x4x8xf32>
    %82 = vector.shape_cast %81 : vector<1x1x4x8xf32> to vector<4x8xf32>
    %cst_86 = arith.constant dense<0.000000e+00> : vector<4x8xf32>
    %83 = tpu.matmul %1, %82, %cst_86 {dimension_numbers = #tpu.dot_dimension_numbers<[1], [0], [0], [1], [0, 0, 1, 1], [], []>} : vector<4x4xf32>, vector<4x8xf32>, vector<4x8xf32> -> vector<4x8xf32>
    %cst_87 = arith.constant dense<0.000000e+00> : vector<4x8xf32>
    %84 = tpu.matmul %5, %80, %cst_87 {dimension_numbers = #tpu.dot_dimension_numbers<[1], [0], [0], [1], [0, 0, 1, 1], [], []>} : vector<4x4xf32>, vector<4x8xf32>, vector<4x8xf32> -> vector<4x8xf32>
    %85 = arith.addf %83, %84 : vector<4x8xf32>
    %86 = vector.broadcast %6 : vector<4x1xf32> to vector<4x8xf32>
    %87 = arith.addf %85, %86 : vector<4x8xf32>
    %cst_88 = arith.constant dense<0.000000e+00> : vector<4x8xf32>
    %88 = tpu.matmul %3, %82, %cst_88 {dimension_numbers = #tpu.dot_dimension_numbers<[1], [0], [0], [1], [0, 0, 1, 1], [], []>} : vector<4x4xf32>, vector<4x8xf32>, vector<4x8xf32> -> vector<4x8xf32>
    %89 = vector.broadcast %6 : vector<4x1xf32> to vector<4x8xf32>
    %90 = arith.addf %88, %89 : vector<4x8xf32>
    %c0_89 = arith.constant 0 : index
    %c0_90 = arith.constant 0 : index
    %c8 = arith.constant 8 : index
    %c0_91 = arith.constant 0 : index
    %91 = vector.load %arg6[%c0_89, %c0_90, %c8, %c0_91] : memref<1x4x16x8xf32, #tpu.memory_space<vmem>>, vector<1x4x1x8xf32>
    %92 = vector.shape_cast %91 : vector<1x4x1x8xf32> to vector<4x8xf32>
    %93 = vector.shape_cast %87 : vector<4x8xf32> to vector<1x4x1x8xf32>
    tpu.vector_store %arg6[%c0_89, %c0_90, %c8, %c0_91], %93 {strides = array<i32>} : memref<1x4x16x8xf32, #tpu.memory_space<vmem>>, vector<1x4x1x8xf32>,
    %c0_92 = arith.constant 0 : index
    %c0_93 = arith.constant 0 : index
    %c9 = arith.constant 9 : index
    %c0_94 = arith.constant 0 : index
    %94 = vector.load %arg6[%c0_92, %c0_93, %c9, %c0_94] : memref<1x4x16x8xf32, #tpu.memory_space<vmem>>, vector<1x4x1x8xf32>
    %95 = vector.shape_cast %94 : vector<1x4x1x8xf32> to vector<4x8xf32>
    %96 = vector.shape_cast %90 : vector<4x8xf32> to vector<1x4x1x8xf32>
    tpu.vector_store %arg6[%c0_92, %c0_93, %c9, %c0_94], %96 {strides = array<i32>} : memref<1x4x16x8xf32, #tpu.memory_space<vmem>>, vector<1x4x1x8xf32>,
    %c0_95 = arith.constant 0 : index
    %c5_96 = arith.constant 5 : index
    %c0_97 = arith.constant 0 : index
    %c0_98 = arith.constant 0 : index
    %97 = vector.load %arg2[%c0_95, %c5_96, %c0_97, %c0_98] : memref<1x8x4x8xf32, #tpu.memory_space<vmem>>, vector<1x1x4x8xf32>
    %98 = vector.shape_cast %97 : vector<1x1x4x8xf32> to vector<4x8xf32>
    %c0_99 = arith.constant 0 : index
    %c6_100 = arith.constant 6 : index
    %c0_101 = arith.constant 0 : index
    %c0_102 = arith.constant 0 : index
    %99 = vector.load %arg2[%c0_99, %c6_100, %c0_101, %c0_102] : memref<1x8x4x8xf32, #tpu.memory_space<vmem>>, vector<1x1x4x8xf32>
    %100 = vector.shape_cast %99 : vector<1x1x4x8xf32> to vector<4x8xf32>
    %cst_103 = arith.constant dense<0.000000e+00> : vector<4x8xf32>
    %101 = tpu.matmul %1, %100, %cst_103 {dimension_numbers = #tpu.dot_dimension_numbers<[1], [0], [0], [1], [0, 0, 1, 1], [], []>} : vector<4x4xf32>, vector<4x8xf32>, vector<4x8xf32> -> vector<4x8xf32>
    %cst_104 = arith.constant dense<0.000000e+00> : vector<4x8xf32>
    %102 = tpu.matmul %5, %98, %cst_104 {dimension_numbers = #tpu.dot_dimension_numbers<[1], [0], [0], [1], [0, 0, 1, 1], [], []>} : vector<4x4xf32>, vector<4x8xf32>, vector<4x8xf32> -> vector<4x8xf32>
    %103 = arith.addf %101, %102 : vector<4x8xf32>
    %104 = vector.broadcast %6 : vector<4x1xf32> to vector<4x8xf32>
    %105 = arith.addf %103, %104 : vector<4x8xf32>
    %cst_105 = arith.constant dense<0.000000e+00> : vector<4x8xf32>
    %106 = tpu.matmul %3, %100, %cst_105 {dimension_numbers = #tpu.dot_dimension_numbers<[1], [0], [0], [1], [0, 0, 1, 1], [], []>} : vector<4x4xf32>, vector<4x8xf32>, vector<4x8xf32> -> vector<4x8xf32>
    %107 = vector.broadcast %6 : vector<4x1xf32> to vector<4x8xf32>
    %108 = arith.addf %106, %107 : vector<4x8xf32>
    %c0_106 = arith.constant 0 : index
    %c0_107 = arith.constant 0 : index
    %c10 = arith.constant 10 : index
    %c0_108 = arith.constant 0 : index
    %109 = vector.load %arg6[%c0_106, %c0_107, %c10, %c0_108] : memref<1x4x16x8xf32, #tpu.memory_space<vmem>>, vector<1x4x1x8xf32>
    %110 = vector.shape_cast %109 : vector<1x4x1x8xf32> to vector<4x8xf32>
    %111 = vector.shape_cast %105 : vector<4x8xf32> to vector<1x4x1x8xf32>
    tpu.vector_store %arg6[%c0_106, %c0_107, %c10, %c0_108], %111 {strides = array<i32>} : memref<1x4x16x8xf32, #tpu.memory_space<vmem>>, vector<1x4x1x8xf32>,
    %c0_109 = arith.constant 0 : index
    %c0_110 = arith.constant 0 : index
    %c11 = arith.constant 11 : index
    %c0_111 = arith.constant 0 : index
    %112 = vector.load %arg6[%c0_109, %c0_110, %c11, %c0_111] : memref<1x4x16x8xf32, #tpu.memory_space<vmem>>, vector<1x4x1x8xf32>
    %113 = vector.shape_cast %112 : vector<1x4x1x8xf32> to vector<4x8xf32>
    %114 = vector.shape_cast %108 : vector<4x8xf32> to vector<1x4x1x8xf32>
    tpu.vector_store %arg6[%c0_109, %c0_110, %c11, %c0_111], %114 {strides = array<i32>} : memref<1x4x16x8xf32, #tpu.memory_space<vmem>>, vector<1x4x1x8xf32>,
    %c0_112 = arith.constant 0 : index
    %c6_113 = arith.constant 6 : index
    %c0_114 = arith.constant 0 : index
    %c0_115 = arith.constant 0 : index
    %115 = vector.load %arg2[%c0_112, %c6_113, %c0_114, %c0_115] : memref<1x8x4x8xf32, #tpu.memory_space<vmem>>, vector<1x1x4x8xf32>
    %116 = vector.shape_cast %115 : vector<1x1x4x8xf32> to vector<4x8xf32>
    %c0_116 = arith.constant 0 : index
    %c7_117 = arith.constant 7 : index
    %c0_118 = arith.constant 0 : index
    %c0_119 = arith.constant 0 : index
    %117 = vector.load %arg2[%c0_116, %c7_117, %c0_118, %c0_119] : memref<1x8x4x8xf32, #tpu.memory_space<vmem>>, vector<1x1x4x8xf32>
    %118 = vector.shape_cast %117 : vector<1x1x4x8xf32> to vector<4x8xf32>
    %cst_120 = arith.constant dense<0.000000e+00> : vector<4x8xf32>
    %119 = tpu.matmul %1, %118, %cst_120 {dimension_numbers = #tpu.dot_dimension_numbers<[1], [0], [0], [1], [0, 0, 1, 1], [], []>} : vector<4x4xf32>, vector<4x8xf32>, vector<4x8xf32> -> vector<4x8xf32>
    %cst_121 = arith.constant dense<0.000000e+00> : vector<4x8xf32>
    %120 = tpu.matmul %5, %116, %cst_121 {dimension_numbers = #tpu.dot_dimension_numbers<[1], [0], [0], [1], [0, 0, 1, 1], [], []>} : vector<4x4xf32>, vector<4x8xf32>, vector<4x8xf32> -> vector<4x8xf32>
    %121 = arith.addf %119, %120 : vector<4x8xf32>
    %122 = vector.broadcast %6 : vector<4x1xf32> to vector<4x8xf32>
    %123 = arith.addf %121, %122 : vector<4x8xf32>
    %cst_122 = arith.constant dense<0.000000e+00> : vector<4x8xf32>
    %124 = tpu.matmul %3, %118, %cst_122 {dimension_numbers = #tpu.dot_dimension_numbers<[1], [0], [0], [1], [0, 0, 1, 1], [], []>} : vector<4x4xf32>, vector<4x8xf32>, vector<4x8xf32> -> vector<4x8xf32>
    %125 = vector.broadcast %6 : vector<4x1xf32> to vector<4x8xf32>
    %126 = arith.addf %124, %125 : vector<4x8xf32>
    %c0_123 = arith.constant 0 : index
    %c0_124 = arith.constant 0 : index
    %c12 = arith.constant 12 : index
    %c0_125 = arith.constant 0 : index
    %127 = vector.load %arg6[%c0_123, %c0_124, %c12, %c0_125] : memref<1x4x16x8xf32, #tpu.memory_space<vmem>>, vector<1x4x1x8xf32>
    %128 = vector.shape_cast %127 : vector<1x4x1x8xf32> to vector<4x8xf32>
    %129 = vector.shape_cast %123 : vector<4x8xf32> to vector<1x4x1x8xf32>
    tpu.vector_store %arg6[%c0_123, %c0_124, %c12, %c0_125], %129 {strides = array<i32>} : memref<1x4x16x8xf32, #tpu.memory_space<vmem>>, vector<1x4x1x8xf32>,
    %c0_126 = arith.constant 0 : index
    %c0_127 = arith.constant 0 : index
    %c13 = arith.constant 13 : index
    %c0_128 = arith.constant 0 : index
    %130 = vector.load %arg6[%c0_126, %c0_127, %c13, %c0_128] : memref<1x4x16x8xf32, #tpu.memory_space<vmem>>, vector<1x4x1x8xf32>
    %131 = vector.shape_cast %130 : vector<1x4x1x8xf32> to vector<4x8xf32>
    %132 = vector.shape_cast %126 : vector<4x8xf32> to vector<1x4x1x8xf32>
    tpu.vector_store %arg6[%c0_126, %c0_127, %c13, %c0_128], %132 {strides = array<i32>} : memref<1x4x16x8xf32, #tpu.memory_space<vmem>>, vector<1x4x1x8xf32>,
    %c0_129 = arith.constant 0 : index
    %c7_130 = arith.constant 7 : index
    %c0_131 = arith.constant 0 : index
    %c0_132 = arith.constant 0 : index
    %133 = vector.load %arg2[%c0_129, %c7_130, %c0_131, %c0_132] : memref<1x8x4x8xf32, #tpu.memory_space<vmem>>, vector<1x1x4x8xf32>
    %134 = vector.shape_cast %133 : vector<1x1x4x8xf32> to vector<4x8xf32>
    %c0_133 = arith.constant 0 : index
    %c0_134 = arith.constant 0 : index
    %c0_135 = arith.constant 0 : index
    %c0_136 = arith.constant 0 : index
    %135 = vector.load %arg3[%c0_133, %c0_134, %c0_135, %c0_136] : memref<1x1x4x8xf32, #tpu.memory_space<vmem>>, vector<1x1x4x8xf32>
    %136 = vector.shape_cast %135 : vector<1x1x4x8xf32> to vector<4x8xf32>
    %cst_137 = arith.constant dense<0.000000e+00> : vector<4x8xf32>
    %137 = tpu.matmul %1, %136, %cst_137 {dimension_numbers = #tpu.dot_dimension_numbers<[1], [0], [0], [1], [0, 0, 1, 1], [], []>} : vector<4x4xf32>, vector<4x8xf32>, vector<4x8xf32> -> vector<4x8xf32>
    %cst_138 = arith.constant dense<0.000000e+00> : vector<4x8xf32>
    %138 = tpu.matmul %5, %134, %cst_138 {dimension_numbers = #tpu.dot_dimension_numbers<[1], [0], [0], [1], [0, 0, 1, 1], [], []>} : vector<4x4xf32>, vector<4x8xf32>, vector<4x8xf32> -> vector<4x8xf32>
    %139 = arith.addf %137, %138 : vector<4x8xf32>
    %140 = vector.broadcast %6 : vector<4x1xf32> to vector<4x8xf32>
    %141 = arith.addf %139, %140 : vector<4x8xf32>
    %cst_139 = arith.constant dense<0.000000e+00> : vector<4x8xf32>
    %142 = tpu.matmul %3, %136, %cst_139 {dimension_numbers = #tpu.dot_dimension_numbers<[1], [0], [0], [1], [0, 0, 1, 1], [], []>} : vector<4x4xf32>, vector<4x8xf32>, vector<4x8xf32> -> vector<4x8xf32>
    %143 = vector.broadcast %6 : vector<4x1xf32> to vector<4x8xf32>
    %144 = arith.addf %142, %143 : vector<4x8xf32>
    %c0_140 = arith.constant 0 : index
    %c0_141 = arith.constant 0 : index
    %c14 = arith.constant 14 : index
    %c0_142 = arith.constant 0 : index
    %145 = vector.load %arg6[%c0_140, %c0_141, %c14, %c0_142] : memref<1x4x16x8xf32, #tpu.memory_space<vmem>>, vector<1x4x1x8xf32>
    %146 = vector.shape_cast %145 : vector<1x4x1x8xf32> to vector<4x8xf32>
    %147 = vector.shape_cast %141 : vector<4x8xf32> to vector<1x4x1x8xf32>
    tpu.vector_store %arg6[%c0_140, %c0_141, %c14, %c0_142], %147 {strides = array<i32>} : memref<1x4x16x8xf32, #tpu.memory_space<vmem>>, vector<1x4x1x8xf32>,
    %c0_143 = arith.constant 0 : index
    %c0_144 = arith.constant 0 : index
    %c15 = arith.constant 15 : index
    %c0_145 = arith.constant 0 : index
    %148 = vector.load %arg6[%c0_143, %c0_144, %c15, %c0_145] : memref<1x4x16x8xf32, #tpu.memory_space<vmem>>, vector<1x4x1x8xf32>
    %149 = vector.shape_cast %148 : vector<1x4x1x8xf32> to vector<4x8xf32>
    %150 = vector.shape_cast %144 : vector<4x8xf32> to vector<1x4x1x8xf32>
    tpu.vector_store %arg6[%c0_143, %c0_144, %c15, %c0_145], %150 {strides = array<i32>} : memref<1x4x16x8xf32, #tpu.memory_space<vmem>>, vector<1x4x1x8xf32>,
    return
  }
  func.func @transform_0(%arg0: i32, %arg1: i32) -> (i32, i32, i32, i32) {
    %c0_i32 = arith.constant 0 : i32
    %c0_i32_0 = arith.constant 0 : i32
    %c0_i32_1 = arith.constant 0 : i32
    return %arg0, %arg1, %c0_i32, %c0_i32_0 : i32, i32, i32, i32
  }
  func.func @transform_1(%arg0: i32, %arg1: i32) -> (i32, i32, i32, i32) {
    %c8_i32 = arith.constant 8 : i32
    %0 = arith.muli %arg1, %c8_i32 : i32
    %c8_i32_0 = arith.constant 8 : i32
    %1 = arith.addi %0, %c8_i32_0 : i32
    %c0_i32 = arith.constant 0 : i32
    %c0_i32_1 = arith.constant 0 : i32
    %c0_i32_2 = arith.constant 0 : i32
    return %arg0, %1, %c0_i32, %c0_i32_1 : i32, i32, i32, i32
  }
  func.func @transform_2(%arg0: i32, %arg1: i32) -> (i32, i32, i32) {
    %c0_i32 = arith.constant 0 : i32
    %c0_i32_0 = arith.constant 0 : i32
    %c0_i32_1 = arith.constant 0 : i32
    %c0_i32_2 = arith.constant 0 : i32
    return %c0_i32, %c0_i32_0, %c0_i32_1 : i32, i32, i32
  }
  func.func @transform_3(%arg0: i32, %arg1: i32) -> (i32, i32) {
    %c0_i32 = arith.constant 0 : i32
    %c0_i32_0 = arith.constant 0 : i32
    %c0_i32_1 = arith.constant 0 : i32
    return %c0_i32, %c0_i32_0 : i32, i32
  }
  func.func @transform_4(%arg0: i32, %arg1: i32) -> (i32, i32, i32, i32) {
    %c0_i32 = arith.constant 0 : i32
    %c0_i32_0 = arith.constant 0 : i32
    %c0_i32_1 = arith.constant 0 : i32
    return %arg0, %c0_i32, %arg1, %c0_i32_0 : i32, i32, i32, i32
  }
}

</mosaic_0001>

<bundles_post_ra>
// kernel: tpu_custom_call.1
= control target key start
LH: loop header
LB: loop body
LE: loop exit
PB: predicated region body
PF: predicated region fallthrough
CT: control target
= control target key end

     0   :  { %s3029_s15 = smov 0   ;;  %s3031_s16 = smov 0   ;;  %s3447_s0 = inlined_call_operand.vmem [shape: f32[2,16,4,8], index: 0, kind: input, shape index: {}]   ;;  %s3448_s1 = inlined_call_operand.vmem [shape: f32[2,16,4,8], index: 1, kind: input, shape index: {}]   ;;  %s3449_s2 = inlined_call_operand.vmem [shape: f32[3,4,4], index: 2, kind: input, shape index: {}]   ;;  %s3450_s3 = inlined_call_operand.vmem [shape: f32[4,1], index: 3, kind: input, shape index: {}]   ;;  %s3451_s4 = inlined_call_operand.vmem [shape: f32[2,4,16,8], index: 4, kind: output, shape index: {}]  }
   0x1   :  { %s3033_s17 = smov 0  }
   0x2 LB: > { %s26_s18 = sadd.s32 1, %s2994_s16  ;;  %p2701_p0 = scmp.ge.s32.totalorder %s2998_s17, 1  ;;  %s2998_s17 = sphi %s3033_s17, %s14_s17   ;;  %s2994_s16 = sphi %s3031_s16, %s3453_s16   ;;  %s2990_s15 = sphi %s3029_s15, %s3452_s15  }
   0x3   : > { %p28_p1 = scmp.ge.s32.totalorder %s26_s18, 2  ;;  %p206_p2 = scmp.lt.s32.totalorder %s2998_s17, 3 }
   0x5   : > { %s3455_s18 = smov (%p28_p1, %s26_s18), 0  ;;  %p207_p3 = pnand %p2701_p0, %p206_p2 }
   0x6   : > { %p251_p4 = scmp.lt.s32.totalorder (!%p207_p3), %s2990_s15, 1  ;;  %v3000_v0 = vmov (!%p207_p3), 0.0   ;;  %vm3001_vm0 = vmmov (!%p207_p3), 0   ;;  %v287_v1 = vld [vmem:[%s3450_s3] sm:$0xf] (!%p207_p3)  ;;  %v3002_v2 = vmov (!%p207_p3), 0   ;;  %v528_v24 = vlaneseq (!%p207_p3) }
   0x7   : > { %210 = sbr.rel (%p207_p3) target bundleno = 288 (0x120), region = 36  ;;  %2827 = vmatprep.subr.mxu0 (!%p207_p3), %v3000_v0  ;;  %2829 = vmatprep.mubr.msk.f32.mxu0 (!%p207_p3), %vm3001_vm0, %v3000_v0  ;;  %vm295_vm1 = vcmask (!%p207_p3), 1043456   ;;  %v3067_v3 = vld [vmem:[%s3449_s2 + $0x8] sm:$0xf] (!%p207_p3)  ;;  %vm291_vm2 = vcmask (!%p207_p3), 31744   ;;  %vm553_vm3 = vcmask (!%p207_p3), 57344  }
   0x8   : > { %2832 = vmatprep.subr.mxu1 (!%p207_p3), %v3000_v0  ;;  %2834 = vmatprep.mubr.msk.f32.mxu1 (!%p207_p3), %vm3001_vm0, %v3000_v0  ;;  %v3074_v6 = vld [vmem:[%s3449_s2] sm:$0xf] (!%p207_p3)  ;;  %v3088_v8 = vld [vmem:[%s3449_s2 + $0x4] sm:$0xf] (!%p207_p3)  ;;  %v3003_v22 = vmov (!%p207_p3), 1966171168  }
   0x9   : > { %2975 = vset.pattern.permute.xlu0 (!%p207_p3), %v3002_v2  ;;  %v526_v23 = vunpack.c.l.s4 (!%p207_p3), %v3003_v22  ;;  %v529_v26 = vshrl.u32 (!%p207_p3), %v528_v24, 7 }
   0xa   : > { %447 = vperm.xlu0 (!%p207_p3), %2975, %v287_v1  }
   0xb   : > { %v527_v25 = vunpack.c.0.s8 (!%p207_p3), %v526_v23 }
   0xd   : > { %v3238_v32 = vsub.s32 (!%p207_p3), %v527_v25, %v529_v26 }
   0xe   : > { %s3457_s15 = smov (!%p251_p4, %s2990_s15), 1 }
   0xf   : > { %s3056_s21 = sshll.u32 %s3457_s15, 6 }
  0x10   : > { %s3062_s24 = scalar_lea.vmem %s3447_s0, %s3056_s21  ;;  %s2776_s5 = sadd.s32 32, %s3056_s21 }
  0x11   : > { %v288_v4 = vld [vmem:[%s3062_s24] sm:$0xf]  ;;  %v2710_v5 = vld [vmem:[%s3062_s24 + $0x4] sm:$0xf]  ;;  %v2718_v9 = vld [vmem:[%s3062_s24 + $0x8] sm:$0xf]  ;;  %s269_s8 = scalar_lea.vmem %s3448_s1, %s2776_s5  ;;  %s3247_s11 = scalar_lea.vmem %s3451_s4, %s3056_s21 }
  0x12   : > { %2828 = vmatpush3.msk.msra.mxu0 %vm295_vm1, %v288_v4  ;;  %2833 = vmatpush3.msk.msra.mxu1 %vm295_vm1, %v2710_v5  ;;  %v2717_v7 = vld [vmem:[%s3062_s24 + $0x4] sm:$0xf]  ;;  %v2725_v10 = vld [vmem:[%s3062_s24 + $0x8] sm:$0xf]  ;;  %v2726_v11 = vld [vmem:[%s3062_s24 + $0xc] sm:$0xf] }
  0x13   : > { %2830 = vmatmul.mubr.msk.f32.vlgmr.msra.gmra.mrb[0].mxu0 %vm291_vm2, %v3067_v3  ;;  %2837 = vmatprep.subr.mxu0 %v3000_v0  ;;  %v2733_v12 = vld [vmem:[%s3062_s24 + $0xc] sm:$0xf]  ;;  %v2734_v13 = vld [vmem:[%s3062_s24 + $0x10] sm:$0xf]  ;;  %v2742_v15 = vld [vmem:[%s3062_s24 + $0x14] sm:$0xf] }
  0x14   : > { %2835 = vmatmul.mubr.msk.f32.vlgmr.msra.gmra.mrb[0].mxu1 %vm291_vm2, %v3074_v6  ;;  %2838 = vmatpush3.msk.msra.mxu0 %vm295_vm1, %v2710_v5  ;;  %v2741_v14 = vld [vmem:[%s3062_s24 + $0x10] sm:$0xf]  ;;  %v2749_v16 = vld [vmem:[%s3062_s24 + $0x14] sm:$0xf]  ;;  %v2750_v17 = vld [vmem:[%s3062_s24 + $0x18] sm:$0xf] }
  0x15   : > { %2842 = vmatprep.subr.mxu1 %v3000_v0  ;;  %2839 = vmatprep.mubr.msk.f32.mxu0 %vm3001_vm0, %v3000_v0  ;;  %v2757_v18 = vld [vmem:[%s3062_s24 + $0x18] sm:$0xf]  ;;  %v2758_v19 = vld [vmem:[%s3062_s24 + $0x1c] sm:$0xf]  ;;  %v2308_v21 = vld [vmem:[%s269_s8] sm:$0xf] }
  0x16   : > { %2843 = vmatpush3.msk.msra.mxu1 %vm295_vm1, %v2717_v7  ;;  %2844 = vmatprep.mubr.msk.f32.mxu1 %vm3001_vm0, %v3000_v0  ;;  %v2765_v20 = vld [vmem:[%s3062_s24 + $0x1c] sm:$0xf] }
  0x17   : > { %2840 = vmatmul.mubr.msk.f32.vlgmr.msra.gmra.mrb[2].mxu0 %vm291_vm2, %v3088_v8  ;;  %2847 = vmatprep.subr.mxu0 %v3000_v0 }
  0x18   : > { %2845 = vmatmul.mubr.msk.f32.vlgmr.msra.gmra.mrb[2].mxu1 %vm291_vm2, %v3067_v3  ;;  %2848 = vmatpush3.msk.msra.mxu0 %vm295_vm1, %v2718_v9 }
  0x19   : > { %2852 = vmatprep.subr.mxu1 %v3000_v0  ;;  %2849 = vmatprep.mubr.msk.f32.mxu0 %vm3001_vm0, %v3000_v0 }
  0x1a   : > { %2853 = vmatpush3.msk.msra.mxu1 %vm295_vm1, %v2718_v9  ;;  %2854 = vmatprep.mubr.msk.f32.mxu1 %vm3001_vm0, %v3000_v0 }
  0x1b   : > { %2850 = vmatmul.mubr.msk.f32.vlgmr.msra.gmra.mrb[4].mxu0 %vm291_vm2, %v3074_v6  ;;  %2857 = vmatprep.subr.mxu0 %v3000_v0 }
  0x1c   : > { %2855 = vmatmul.mubr.msk.f32.vlgmr.msra.gmra.mrb[4].mxu1 %vm291_vm2, %v3088_v8  ;;  %2858 = vmatpush3.msk.msra.mxu0 %vm295_vm1, %v2725_v10 }
  0x1d   : > { %2862 = vmatprep.subr.mxu1 %v3000_v0  ;;  %2859 = vmatprep.mubr.msk.f32.mxu0 %vm3001_vm0, %v3000_v0 }
  0x1e   : > { %2863 = vmatpush3.msk.msra.mxu1 %vm295_vm1, %v2726_v11  ;;  %2864 = vmatprep.mubr.msk.f32.mxu1 %vm3001_vm0, %v3000_v0 }
  0x1f   : > { %2860 = vmatmul.mubr.msk.f32.vlgmr.msra.gmra.mrb[6].mxu0 %vm291_vm2, %v3067_v3  ;;  %2867 = vmatprep.subr.mxu0 %v3000_v0 }
  0x20   : > { %2865 = vmatmul.mubr.msk.f32.vlgmr.msra.gmra.mrb[6].mxu1 %vm291_vm2, %v3074_v6  ;;  %2868 = vmatpush3.msk.msra.mxu0 %vm295_vm1, %v2726_v11 }
  0x21   : > { %2872 = vmatprep.subr.mxu1 %v3000_v0  ;;  %2869 = vmatprep.mubr.msk.f32.mxu0 %vm3001_vm0, %v3000_v0 }
  0x22   : > { %2873 = vmatpush3.msk.msra.mxu1 %vm295_vm1, %v2733_v12  ;;  %2874 = vmatprep.mubr.msk.f32.mxu1 %vm3001_vm0, %v3000_v0 }
  0x23   : > { %2870 = vmatmul.mubr.msk.f32.vlgmr.msra.gmra.mrb[8].mxu0 %vm291_vm2, %v3088_v8  ;;  %2877 = vmatprep.subr.mxu0 %v3000_v0 }
  0x24   : > { %2875 = vmatmul.mubr.msk.f32.vlgmr.msra.gmra.mrb[8].mxu1 %vm291_vm2, %v3067_v3  ;;  %2878 = vmatpush3.msk.msra.mxu0 %vm295_vm1, %v2734_v13 }
  0x25   : > { %2882 = vmatprep.subr.mxu1 %v3000_v0  ;;  %2879 = vmatprep.mubr.msk.f32.mxu0 %vm3001_vm0, %v3000_v0 }
  0x26   : > { %2883 = vmatpush3.msk.msra.mxu1 %vm295_vm1, %v2734_v13  ;;  %2884 = vmatprep.mubr.msk.f32.mxu1 %vm3001_vm0, %v3000_v0 }
  0x27   : > { %2880 = vmatmul.mubr.msk.f32.vlgmr.msra.gmra.mrb[10].mxu0 %vm291_vm2, %v3074_v6  ;;  %2887 = vmatprep.subr.mxu0 %v3000_v0 }
  0x28   : > { %2885 = vmatmul.mubr.msk.f32.vlgmr.msra.gmra.mrb[10].mxu1 %vm291_vm2, %v3088_v8  ;;  %2888 = vmatpush3.msk.msra.mxu0 %vm295_vm1, %v2741_v14 }
  0x29   : > { %2892 = vmatprep.subr.mxu1 %v3000_v0  ;;  %2889 = vmatprep.mubr.msk.f32.mxu0 %vm3001_vm0, %v3000_v0 }
  0x2a   : > { %2893 = vmatpush3.msk.msra.mxu1 %vm295_vm1, %v2742_v15  ;;  %2894 = vmatprep.mubr.msk.f32.mxu1 %vm3001_vm0, %v3000_v0 }
  0x2b   : > { %2890 = vmatmul.mubr.msk.f32.vlgmr.msra.gmra.mrb[12].mxu0 %vm291_vm2, %v3067_v3  ;;  %2897 = vmatprep.subr.mxu0 %v3000_v0 }
  0x2c   : > { %2895 = vmatmul.mubr.msk.f32.vlgmr.msra.gmra.mrb[12].mxu1 %vm291_vm2, %v3074_v6  ;;  %2898 = vmatpush3.msk.msra.mxu0 %vm295_vm1, %v2742_v15 }
  0x2d   : > { %2902 = vmatprep.subr.mxu1 %v3000_v0  ;;  %2899 = vmatprep.mubr.msk.f32.mxu0 %vm3001_vm0, %v3000_v0 }
  0x2e   : > { %2903 = vmatpush3.msk.msra.mxu1 %vm295_vm1, %v2749_v16  ;;  %2904 = vmatprep.mubr.msk.f32.mxu1 %vm3001_vm0, %v3000_v0 }
  0x2f   : > { %2900 = vmatmul.mubr.msk.f32.vlgmr.msra.gmra.mrb[14].mxu0 %vm291_vm2, %v3088_v8  ;;  %2907 = vmatprep.subr.mxu0 %v3000_v0 }
  0x30   : > { %2905 = vmatmul.mubr.msk.f32.vlgmr.msra.gmra.mrb[14].mxu1 %vm291_vm2, %v3067_v3  ;;  %2908 = vmatpush3.msk.msra.mxu0 %vm295_vm1, %v2750_v17 }
  0x31   : > { %2912 = vmatprep.subr.mxu1 %v3000_v0  ;;  %2909 = vmatprep.mubr.msk.f32.mxu0 %vm3001_vm0, %v3000_v0 }
  0x32   : > { %2913 = vmatpush3.msk.msra.mxu1 %vm295_vm1, %v2750_v17  ;;  %2914 = vmatprep.mubr.msk.f32.mxu1 %vm3001_vm0, %v3000_v0 }
  0x33   : > { %2910 = vmatmul.mubr.msk.f32.vlgmr.msra.gmra.mrb[16].mxu0 %vm291_vm2, %v3074_v6  ;;  %2917 = vmatprep.subr.mxu0 %v3000_v0 }
  0x34   : > { %2915 = vmatmul.mubr.msk.f32.vlgmr.msra.gmra.mrb[16].mxu1 %vm291_vm2, %v3088_v8  ;;  %2918 = vmatpush3.msk.msra.mxu0 %vm295_vm1, %v2757_v18 }
  0x35   : > { %2922 = vmatprep.subr.mxu1 %v3000_v0  ;;  %2919 = vmatprep.mubr.msk.f32.mxu0 %vm3001_vm0, %v3000_v0 }
  0x36   : > { %2923 = vmatpush3.msk.msra.mxu1 %vm295_vm1, %v2758_v19  ;;  %2924 = vmatprep.mubr.msk.f32.mxu1 %vm3001_vm0, %v3000_v0 }
  0x37   : > { %2920 = vmatmul.mubr.msk.f32.vlgmr.msra.gmra.mrb[18].mxu0 %vm291_vm2, %v3067_v3  ;;  %2927 = vmatprep.subr.mxu0 %v3000_v0 }
  0x38   : > { %2925 = vmatmul.mubr.msk.f32.vlgmr.msra.gmra.mrb[18].mxu1 %vm291_vm2, %v3074_v6  ;;  %2928 = vmatpush3.msk.msra.mxu0 %vm295_vm1, %v2758_v19 }
  0x39   : > { %2932 = vmatprep.subr.mxu1 %v3000_v0  ;;  %2929 = vmatprep.mubr.msk.f32.mxu0 %vm3001_vm0, %v3000_v0 }
  0x3a   : > { %2933 = vmatpush3.msk.msra.mxu1 %vm295_vm1, %v2765_v20  ;;  %2937 = vmatprep.subr.mxu0 %v3000_v0 }
  0x3b   : > { %2930 = vmatmul.mubr.msk.f32.vlgmr.msra.gmra.mrb[20].mxu0 %vm291_vm2, %v3088_v8  ;;  %2934 = vmatprep.mubr.msk.f32.mxu1 %vm3001_vm0, %v3000_v0 }
  0x3c   : > { %2938 = vmatpush3.msk.msra.mxu0 %vm295_vm1, %v2308_v21  ;;  %2935 = vmatmul.mubr.msk.f32.vlgmr.msra.gmra.mrb[20].mxu1 %vm291_vm2, %v3067_v3 }
  0x3d   : > { %2942 = vmatprep.subr.mxu1 %v3000_v0  ;;  %2939 = vmatprep.mubr.msk.f32.mxu0 %vm3001_vm0, %v3000_v0 }
  0x3e   : > { %2943 = vmatpush3.msk.msra.mxu1 %vm295_vm1, %v2308_v21  ;;  %2944 = vmatprep.mubr.msk.f32.mxu1 %vm3001_vm0, %v3000_v0 }
  0x3f   : > { %2940 = vmatmul.mubr.msk.f32.vlgmr.msra.gmra.mrb[22].mxu0 %vm291_vm2, %v3074_v6 }
  0x40   : > { %2945 = vmatmul.mubr.msk.f32.vlgmr.msra.gmra.mrb[22].mxu1 %vm291_vm2, %v3088_v8 }
  0x89   : > { %v3236_v28 = vpop.permute.xlu0 %447 }
  0xe6   : > { %v365_v27 = vpop.f32.mrb[0].mxu0 }
  0xe7   : > { %v2831_v29 = vpop.f32.mrb[1].mxu0  ;;  %v441_v30 = vpop.f32.mrb[0].mxu1 }
  0xe8   : > { %v442_v31 = vadd.f32 %v441_v30, %v365_v27  ;;  %v2836_v33 = vpop.f32.mrb[1].mxu1 }
  0xea   : > { %v450_v34 = vadd.f32 %v3236_v28, %v442_v31  ;;  %v520_v35 = vpop.f32.mrb[2].mxu0 }
  0xeb   : > { %v521_v36 = vadd.f32 %v520_v35, %v3236_v28  ;;  %v2841_v37 = vpop.f32.mrb[3].mxu0  ;;  %v663_v38 = vpop.f32.mrb[2].mxu1 }
  0xec   : > { %v531_v39 = vrot.slane %v450_v34, %v3238_v32  ;;  %v2846_v40 = vpop.f32.mrb[3].mxu1 }
  0xed   : > { %v565_v41 = vrot.slane %v521_v36, %v3238_v32 }
  0xee   : > { %v532_v42 = vcombine.high %v531_v39, %v531_v39  ;;  %v539_v43 = vrot.slane %v531_v39, %v3238_v32  ;;  %v736_v44 = vpop.f32.mrb[4].mxu0 }
  0xef   : > { %v566_v45 = vcombine.high %v565_v41, %v565_v41  ;;  %v573_v46 = vrot.slane %v565_v41, %v3238_v32  ;;  %v737_v47 = vadd.f32 %v736_v44, %v663_v38  ;;  %v2851_v48 = vpop.f32.mrb[5].mxu0  ;;  %v807_v49 = vpop.f32.mrb[4].mxu1 }
  0xf0   : > { %v546_v50 = vrot.slane %v532_v42, %v3238_v32  ;;  %v547_v51 = vcombine.high %v539_v43, %v539_v43  ;;  %554 = vst.msk [vmem:[%s3247_s11] sm:$0x1] %vm553_vm3, %v539_v43  ;;  %v808_v52 = vadd.f32 %v807_v49, %v3236_v28  ;;  %v2856_v53 = vpop.f32.mrb[5].mxu1 }
  0xf1   : > { %v580_v54 = vrot.slane %v566_v45, %v3238_v32  ;;  %v581_v55 = vcombine.high %v573_v46, %v573_v46  ;;  %587 = vst.msk [vmem:[%s3247_s11 + $0x1] sm:$0x1] %vm553_vm3, %v573_v46  ;;  %v740_v56 = vadd.f32 %v737_v47, %v3236_v28 }
  0xf2   : > { %v548_v57 = vcombine.high %v546_v50, %v546_v50  ;;  %555 = vst.msk [vmem:[%s3247_s11 + $0x10] sm:$0x1] %vm553_vm3, %v546_v50  ;;  %556 = vst.msk [vmem:[%s3247_s11 + $0x20] sm:$0x1] %vm553_vm3, %v547_v51  ;;  %v851_v58 = vrot.slane %v808_v52, %v3238_v32  ;;  %v949_v59 = vpop.f32.mrb[6].mxu0 }
  0xf3   : > { %v582_v60 = vcombine.high %v580_v54, %v580_v54  ;;  %588 = vst.msk [vmem:[%s3247_s11 + $0x11] sm:$0x1] %vm553_vm3, %v580_v54  ;;  %589 = vst.msk [vmem:[%s3247_s11 + $0x21] sm:$0x1] %vm553_vm3, %v581_v55  ;;  %v818_v61 = vrot.slane %v740_v56, %v3238_v32  ;;  %v2861_v62 = vpop.f32.mrb[7].mxu0  ;;  %v1022_v63 = vpop.f32.mrb[6].mxu1 }
  0xf4   : > { %557 = vst.msk [vmem:[%s3247_s11 + $0x30] sm:$0x1] %vm553_vm3, %v548_v57  ;;  %v852_v0 = vcombine.high %v851_v58, %v851_v58  ;;  %v859_v1 = vrot.slane %v851_v58, %v3238_v32  ;;  %v1023_v2 = vadd.f32 %v1022_v63, %v949_v59  ;;  %v2866_v3 = vpop.f32.mrb[7].mxu1 }
  0xf5   : > { %590 = vst.msk [vmem:[%s3247_s11 + $0x31] sm:$0x1] %vm553_vm3, %v582_v60  ;;  %v819_v4 = vcombine.high %v818_v61, %v818_v61  ;;  %v826_v5 = vrot.slane %v818_v61, %v3238_v32 }
  0xf6   : > { %v866_v6 = vrot.slane %v852_v0, %v3238_v32  ;;  %v867_v7 = vcombine.high %v859_v1, %v859_v1  ;;  %873 = vst.msk [vmem:[%s3247_s11 + $0x3] sm:$0x1] %vm553_vm3, %v859_v1  ;;  %v1026_v8 = vadd.f32 %v1023_v2, %v3236_v28  ;;  %v1093_v9 = vpop.f32.mrb[8].mxu0 }
  0xf7   : > { %v833_v10 = vrot.slane %v819_v4, %v3238_v32  ;;  %v834_v11 = vcombine.high %v826_v5, %v826_v5  ;;  %840 = vst.msk [vmem:[%s3247_s11 + $0x2] sm:$0x1] %vm553_vm3, %v826_v5  ;;  %v1094_v12 = vadd.f32 %v1093_v9, %v3236_v28  ;;  %v2871_v13 = vpop.f32.mrb[9].mxu0  ;;  %v1235_v14 = vpop.f32.mrb[8].mxu1 }
  0xf8   : > { %v868_v15 = vcombine.high %v866_v6, %v866_v6  ;;  %874 = vst.msk [vmem:[%s3247_s11 + $0x13] sm:$0x1] %vm553_vm3, %v866_v6  ;;  %875 = vst.msk [vmem:[%s3247_s11 + $0x23] sm:$0x1] %vm553_vm3, %v867_v7  ;;  %v1104_v16 = vrot.slane %v1026_v8, %v3238_v32  ;;  %v2876_v17 = vpop.f32.mrb[9].mxu1 }
  0xf9   : > { %v835_v18 = vcombine.high %v833_v10, %v833_v10  ;;  %841 = vst.msk [vmem:[%s3247_s11 + $0x12] sm:$0x1] %vm553_vm3, %v833_v10  ;;  %842 = vst.msk [vmem:[%s3247_s11 + $0x22] sm:$0x1] %vm553_vm3, %v834_v11  ;;  %v1137_v19 = vrot.slane %v1094_v12, %v3238_v32 }
  0xfa   : > { %876 = vst.msk [vmem:[%s3247_s11 + $0x33] sm:$0x1] %vm553_vm3, %v868_v15  ;;  %v1105_v20 = vcombine.high %v1104_v16, %v1104_v16  ;;  %v1112_v21 = vrot.slane %v1104_v16, %v3238_v32  ;;  %v1308_v22 = vpop.f32.mrb[10].mxu0 }
  0xfb   : > { %843 = vst.msk [vmem:[%s3247_s11 + $0x32] sm:$0x1] %vm553_vm3, %v835_v18  ;;  %v1138_v23 = vcombine.high %v1137_v19, %v1137_v19  ;;  %v1145_v24 = vrot.slane %v1137_v19, %v3238_v32  ;;  %v1309_v25 = vadd.f32 %v1308_v22, %v1235_v14  ;;  %v2881_v26 = vpop.f32.mrb[11].mxu0  ;;  %v1379_v27 = vpop.f32.mrb[10].mxu1 }
  0xfc   : > { %v1119_v29 = vrot.slane %v1105_v20, %v3238_v32  ;;  %v1120_v30 = vcombine.high %v1112_v21, %v1112_v21  ;;  %1126 = vst.msk [vmem:[%s3247_s11 + $0x4] sm:$0x1] %vm553_vm3, %v1112_v21  ;;  %v1380_v31 = vadd.f32 %v1379_v27, %v3236_v28  ;;  %v2886_v33 = vpop.f32.mrb[11].mxu1 }
  0xfd   : > { %v1152_v34 = vrot.slane %v1138_v23, %v3238_v32  ;;  %v1153_v35 = vcombine.high %v1145_v24, %v1145_v24  ;;  %1159 = vst.msk [vmem:[%s3247_s11 + $0x5] sm:$0x1] %vm553_vm3, %v1145_v24  ;;  %v1312_v36 = vadd.f32 %v1309_v25, %v3236_v28 }
  0xfe   : > { %v1121_v37 = vcombine.high %v1119_v29, %v1119_v29  ;;  %1127 = vst.msk [vmem:[%s3247_s11 + $0x14] sm:$0x1] %vm553_vm3, %v1119_v29  ;;  %1128 = vst.msk [vmem:[%s3247_s11 + $0x24] sm:$0x1] %vm553_vm3, %v1120_v30  ;;  %v1423_v38 = vrot.slane %v1380_v31, %v3238_v32  ;;  %v1521_v39 = vpop.f32.mrb[12].mxu0 }
  0xff   : > { %v1154_v40 = vcombine.high %v1152_v34, %v1152_v34  ;;  %1160 = vst.msk [vmem:[%s3247_s11 + $0x15] sm:$0x1] %vm553_vm3, %v1152_v34  ;;  %1161 = vst.msk [vmem:[%s3247_s11 + $0x25] sm:$0x1] %vm553_vm3, %v1153_v35  ;;  %v1390_v41 = vrot.slane %v1312_v36, %v3238_v32  ;;  %v2891_v42 = vpop.f32.mrb[13].mxu0  ;;  %v1594_v43 = vpop.f32.mrb[12].mxu1 }
 0x100   : > { %1129 = vst.msk [vmem:[%s3247_s11 + $0x34] sm:$0x1] %vm553_vm3, %v1121_v37  ;;  %v1424_v44 = vcombine.high %v1423_v38, %v1423_v38  ;;  %v1431_v45 = vrot.slane %v1423_v38, %v3238_v32  ;;  %v1595_v46 = vadd.f32 %v1594_v43, %v1521_v39  ;;  %v2896_v47 = vpop.f32.mrb[13].mxu1 }
 0x101   : > { %1162 = vst.msk [vmem:[%s3247_s11 + $0x35] sm:$0x1] %vm553_vm3, %v1154_v40  ;;  %v1391_v48 = vcombine.high %v1390_v41, %v1390_v41  ;;  %v1398_v49 = vrot.slane %v1390_v41, %v3238_v32 }
 0x102   : > { %v1438_v50 = vrot.slane %v1424_v44, %v3238_v32  ;;  %v1439_v51 = vcombine.high %v1431_v45, %v1431_v45  ;;  %1445 = vst.msk [vmem:[%s3247_s11 + $0x7] sm:$0x1] %vm553_vm3, %v1431_v45  ;;  %v1598_v52 = vadd.f32 %v1595_v46, %v3236_v28  ;;  %v1665_v53 = vpop.f32.mrb[14].mxu0 }
 0x103   : > { %v1405_v54 = vrot.slane %v1391_v48, %v3238_v32  ;;  %v1406_v55 = vcombine.high %v1398_v49, %v1398_v49  ;;  %1412 = vst.msk [vmem:[%s3247_s11 + $0x6] sm:$0x1] %vm553_vm3, %v1398_v49  ;;  %v1666_v56 = vadd.f32 %v1665_v53, %v3236_v28  ;;  %v2901_v57 = vpop.f32.mrb[15].mxu0  ;;  %v1807_v58 = vpop.f32.mrb[14].mxu1 }
 0x104   : > { %v1440_v59 = vcombine.high %v1438_v50, %v1438_v50  ;;  %1446 = vst.msk [vmem:[%s3247_s11 + $0x17] sm:$0x1] %vm553_vm3, %v1438_v50  ;;  %1447 = vst.msk [vmem:[%s3247_s11 + $0x27] sm:$0x1] %vm553_vm3, %v1439_v51  ;;  %v1676_v60 = vrot.slane %v1598_v52, %v3238_v32  ;;  %v2906_v61 = vpop.f32.mrb[15].mxu1 }
 0x105   : > { %v1407_v62 = vcombine.high %v1405_v54, %v1405_v54  ;;  %1413 = vst.msk [vmem:[%s3247_s11 + $0x16] sm:$0x1] %vm553_vm3, %v1405_v54  ;;  %1414 = vst.msk [vmem:[%s3247_s11 + $0x26] sm:$0x1] %vm553_vm3, %v1406_v55  ;;  %v1709_v63 = vrot.slane %v1666_v56, %v3238_v32 }
 0x106   : > { %1448 = vst.msk [vmem:[%s3247_s11 + $0x37] sm:$0x1] %vm553_vm3, %v1440_v59  ;;  %v1677_v0 = vcombine.high %v1676_v60, %v1676_v60  ;;  %v1684_v1 = vrot.slane %v1676_v60, %v3238_v32  ;;  %v1880_v2 = vpop.f32.mrb[16].mxu0 }
 0x107   : > { %1415 = vst.msk [vmem:[%s3247_s11 + $0x36] sm:$0x1] %vm553_vm3, %v1407_v62  ;;  %v1710_v3 = vcombine.high %v1709_v63, %v1709_v63  ;;  %v1717_v4 = vrot.slane %v1709_v63, %v3238_v32  ;;  %v1881_v5 = vadd.f32 %v1880_v2, %v1807_v58  ;;  %v2911_v6 = vpop.f32.mrb[17].mxu0  ;;  %v1951_v7 = vpop.f32.mrb[16].mxu1 }
 0x108   : > { %v1691_v8 = vrot.slane %v1677_v0, %v3238_v32  ;;  %v1692_v9 = vcombine.high %v1684_v1, %v1684_v1  ;;  %1698 = vst.msk [vmem:[%s3247_s11 + $0x8] sm:$0x1] %vm553_vm3, %v1684_v1  ;;  %v1952_v10 = vadd.f32 %v1951_v7, %v3236_v28  ;;  %v2916_v11 = vpop.f32.mrb[17].mxu1 }
 0x109   : > { %v1724_v12 = vrot.slane %v1710_v3, %v3238_v32  ;;  %v1725_v13 = vcombine.high %v1717_v4, %v1717_v4  ;;  %1731 = vst.msk [vmem:[%s3247_s11 + $0x9] sm:$0x1] %vm553_vm3, %v1717_v4  ;;  %v1884_v14 = vadd.f32 %v1881_v5, %v3236_v28 }
 0x10a   : > { %v1693_v15 = vcombine.high %v1691_v8, %v1691_v8  ;;  %1699 = vst.msk [vmem:[%s3247_s11 + $0x18] sm:$0x1] %vm553_vm3, %v1691_v8  ;;  %1700 = vst.msk [vmem:[%s3247_s11 + $0x28] sm:$0x1] %vm553_vm3, %v1692_v9  ;;  %v1995_v16 = vrot.slane %v1952_v10, %v3238_v32  ;;  %v2093_v17 = vpop.f32.mrb[18].mxu0 }
 0x10b   : > { %v1726_v18 = vcombine.high %v1724_v12, %v1724_v12  ;;  %1732 = vst.msk [vmem:[%s3247_s11 + $0x19] sm:$0x1] %vm553_vm3, %v1724_v12  ;;  %1733 = vst.msk [vmem:[%s3247_s11 + $0x29] sm:$0x1] %vm553_vm3, %v1725_v13  ;;  %v1962_v19 = vrot.slane %v1884_v14, %v3238_v32  ;;  %v2921_v20 = vpop.f32.mrb[19].mxu0  ;;  %v2166_v21 = vpop.f32.mrb[18].mxu1 }
 0x10c   : > { %1701 = vst.msk [vmem:[%s3247_s11 + $0x38] sm:$0x1] %vm553_vm3, %v1693_v15  ;;  %v1996_v22 = vcombine.high %v1995_v16, %v1995_v16  ;;  %v2003_v23 = vrot.slane %v1995_v16, %v3238_v32  ;;  %v2167_v24 = vadd.f32 %v2166_v21, %v2093_v17  ;;  %v2926_v25 = vpop.f32.mrb[19].mxu1 }
 0x10d   : > { %1734 = vst.msk [vmem:[%s3247_s11 + $0x39] sm:$0x1] %vm553_vm3, %v1726_v18  ;;  %v1963_v26 = vcombine.high %v1962_v19, %v1962_v19  ;;  %v1970_v27 = vrot.slane %v1962_v19, %v3238_v32 }
 0x10e   : > { %v2010_v29 = vrot.slane %v1996_v22, %v3238_v32  ;;  %v2011_v30 = vcombine.high %v2003_v23, %v2003_v23  ;;  %2017 = vst.msk [vmem:[%s3247_s11 + $0xb] sm:$0x1] %vm553_vm3, %v2003_v23  ;;  %v2170_v31 = vadd.f32 %v2167_v24, %v3236_v28  ;;  %v2237_v33 = vpop.f32.mrb[20].mxu0 }
 0x10f   : > { %v1977_v34 = vrot.slane %v1963_v26, %v3238_v32  ;;  %v1978_v35 = vcombine.high %v1970_v27, %v1970_v27  ;;  %1984 = vst.msk [vmem:[%s3247_s11 + $0xa] sm:$0x1] %vm553_vm3, %v1970_v27  ;;  %v2238_v36 = vadd.f32 %v2237_v33, %v3236_v28  ;;  %v2931_v37 = vpop.f32.mrb[21].mxu0  ;;  %v2378_v38 = vpop.f32.mrb[20].mxu1 }
 0x110   : > { %v2012_v39 = vcombine.high %v2010_v29, %v2010_v29  ;;  %2018 = vst.msk [vmem:[%s3247_s11 + $0x1b] sm:$0x1] %vm553_vm3, %v2010_v29  ;;  %2019 = vst.msk [vmem:[%s3247_s11 + $0x2b] sm:$0x1] %vm553_vm3, %v2011_v30  ;;  %v2248_v40 = vrot.slane %v2170_v31, %v3238_v32  ;;  %v2936_v41 = vpop.f32.mrb[21].mxu1 }
 0x111   : > { %v1979_v42 = vcombine.high %v1977_v34, %v1977_v34  ;;  %1985 = vst.msk [vmem:[%s3247_s11 + $0x1a] sm:$0x1] %vm553_vm3, %v1977_v34  ;;  %1986 = vst.msk [vmem:[%s3247_s11 + $0x2a] sm:$0x1] %vm553_vm3, %v1978_v35  ;;  %v2281_v43 = vrot.slane %v2238_v36, %v3238_v32 }
 0x112   : > { %2020 = vst.msk [vmem:[%s3247_s11 + $0x3b] sm:$0x1] %vm553_vm3, %v2012_v39  ;;  %v2249_v44 = vcombine.high %v2248_v40, %v2248_v40  ;;  %v2256_v45 = vrot.slane %v2248_v40, %v3238_v32  ;;  %v2451_v46 = vpop.f32.mrb[22].mxu0 }
 0x113   : > { %1987 = vst.msk [vmem:[%s3247_s11 + $0x3a] sm:$0x1] %vm553_vm3, %v1979_v42  ;;  %v2282_v47 = vcombine.high %v2281_v43, %v2281_v43  ;;  %v2289_v48 = vrot.slane %v2281_v43, %v3238_v32  ;;  %v2452_v49 = vadd.f32 %v2451_v46, %v2378_v38  ;;  %v2941_v50 = vpop.f32.mrb[23].mxu0  ;;  %v2522_v51 = vpop.f32.mrb[22].mxu1 }
 0x114   : > { %v2263_v52 = vrot.slane %v2249_v44, %v3238_v32  ;;  %v2264_v53 = vcombine.high %v2256_v45, %v2256_v45  ;;  %2270 = vst.msk [vmem:[%s3247_s11 + $0xc] sm:$0x1] %vm553_vm3, %v2256_v45  ;;  %v2523_v54 = vadd.f32 %v2522_v51, %v3236_v28  ;;  %v2946_v55 = vpop.f32.mrb[23].mxu1 }
 0x115   : > { %v2296_v56 = vrot.slane %v2282_v47, %v3238_v32  ;;  %v2297_v57 = vcombine.high %v2289_v48, %v2289_v48  ;;  %2303 = vst.msk [vmem:[%s3247_s11 + $0xd] sm:$0x1] %vm553_vm3, %v2289_v48  ;;  %v2455_v58 = vadd.f32 %v2452_v49, %v3236_v28 }
 0x116   : > { %v2265_v59 = vcombine.high %v2263_v52, %v2263_v52  ;;  %2271 = vst.msk [vmem:[%s3247_s11 + $0x1c] sm:$0x1] %vm553_vm3, %v2263_v52  ;;  %2272 = vst.msk [vmem:[%s3247_s11 + $0x2c] sm:$0x1] %vm553_vm3, %v2264_v53  ;;  %v2566_v60 = vrot.slane %v2523_v54, %v3238_v32 }
 0x117   : > { %v2298_v61 = vcombine.high %v2296_v56, %v2296_v56  ;;  %2304 = vst.msk [vmem:[%s3247_s11 + $0x1d] sm:$0x1] %vm553_vm3, %v2296_v56  ;;  %2305 = vst.msk [vmem:[%s3247_s11 + $0x2d] sm:$0x1] %vm553_vm3, %v2297_v57  ;;  %v2533_v62 = vrot.slane %v2455_v58, %v3238_v32 }
 0x118   : > { %2273 = vst.msk [vmem:[%s3247_s11 + $0x3c] sm:$0x1] %vm553_vm3, %v2265_v59  ;;  %v2567_v28 = vcombine.high %v2566_v60, %v2566_v60  ;;  %v2574_v63 = vrot.slane %v2566_v60, %v3238_v32 }
 0x119   : > { %2306 = vst.msk [vmem:[%s3247_s11 + $0x3d] sm:$0x1] %vm553_vm3, %v2298_v61  ;;  %v2534_v0 = vcombine.high %v2533_v62, %v2533_v62  ;;  %v2541_v1 = vrot.slane %v2533_v62, %v3238_v32 }
 0x11a   : > { %v2581_v2 = vrot.slane %v2567_v28, %v3238_v32  ;;  %v2582_v3 = vcombine.high %v2574_v63, %v2574_v63  ;;  %2588 = vst.msk [vmem:[%s3247_s11 + $0xf] sm:$0x1] %vm553_vm3, %v2574_v63 }
 0x11b   : > { %v2548_v4 = vrot.slane %v2534_v0, %v3238_v32  ;;  %v2549_v5 = vcombine.high %v2541_v1, %v2541_v1  ;;  %2555 = vst.msk [vmem:[%s3247_s11 + $0xe] sm:$0x1] %vm553_vm3, %v2541_v1 }
 0x11c   : > { %v2583_v6 = vcombine.high %v2581_v2, %v2581_v2  ;;  %2589 = vst.msk [vmem:[%s3247_s11 + $0x1f] sm:$0x1] %vm553_vm3, %v2581_v2  ;;  %2590 = vst.msk [vmem:[%s3247_s11 + $0x2f] sm:$0x1] %vm553_vm3, %v2582_v3 }
 0x11d   : > { %v2550_v7 = vcombine.high %v2548_v4, %v2548_v4  ;;  %2556 = vst.msk [vmem:[%s3247_s11 + $0x1e] sm:$0x1] %vm553_vm3, %v2548_v4  ;;  %2557 = vst.msk [vmem:[%s3247_s11 + $0x2e] sm:$0x1] %vm553_vm3, %v2549_v5 }
 0x11e   : > { %2591 = vst.msk [vmem:[%s3247_s11 + $0x3f] sm:$0x1] %vm553_vm3, %v2583_v6 }
 0x11f   : > { %2558 = vst.msk [vmem:[%s3247_s11 + $0x3e] sm:$0x1] %vm553_vm3, %v2550_v7 }
 0x120 PF: > { %s14_s17 = sadd.s32 1, %s2998_s17   ;;  %s3452_s15 = smov %s2994_s16 }
 0x121   : > { %p11_p5 = scmp.ge.s32.totalorder %s14_s17, 4   ;;  %s3453_s16 = smov %s3455_s18 }
 0x123   :  { %13 = sbr.rel (!%p11_p5) target bundleno = 2 (0x2), region = 78 }

</bundles_post_ra>
